<compile_context>
chip_gen: v7x
topology: tpu7x:2x2x1
jax: 0.10.0
libtpu: 0.0.40
codegen_flags: <defaults>
</compile_context>

<pallas_src>
import jax
import jax.numpy as jnp
from jax import lax
from jax.experimental import pallas as pl
from jax.experimental.pallas import tpu as pltpu

_LANE = 128  # pad the bin axis to a full vreg lane width


def _make_ece_kernel(t: float, n_bins: int, n_total: int, tile_n: int):
    scale = 1.0 / float(t)
    inv_nbins = 1.0 / float(n_bins)

    def ece_kernel(logits_ref, labels_ref, out_ref, bin_acc_ref):
        step = pl.program_id(0)
        num_steps = pl.num_programs(0)

        @pl.when(step == 0)
        def _init():
            bin_acc_ref[...] = jnp.zeros_like(bin_acc_ref)

        x = logits_ref[...].astype(jnp.float32)                    # [tile_n, C]
        if scale != 1.0:
            x = x * jnp.float32(scale)
        tn, c = x.shape

        # conf = max(softmax(x)) = 1 / sum(exp(x - max(x)))  (no [N,C] normalize)
        m = jnp.max(x, axis=1, keepdims=True)                      # [tile_n, 1]
        s = jnp.sum(jnp.exp(x - m), axis=1, keepdims=True)         # [tile_n, 1]
        conf = 1.0 / s                                             # [tile_n, 1]

        # pred = first argmax (torch.max tie-break); argmax(x) == argmax(softmax(x))
        cls_idx = lax.broadcasted_iota(jnp.int32, x.shape, 1)
        pred = jnp.min(jnp.where(x == m, cls_idx, jnp.int32(c)),
                       axis=1, keepdims=True)                      # [tile_n, 1]

        labels = labels_ref[...]                                   # [tile_n, 1] int32
        acc = (pred == labels).astype(jnp.float32)                 # [tile_n, 1]

        # mask rows beyond N (ragged last tile)
        row = lax.broadcasted_iota(jnp.int32, (tn, 1), 0) + step * tile_n
        d = jnp.where(row < n_total, conf - acc, 0.0)              # [tile_n, 1]

        # uniform-bin membership, bin b covers (b/n_bins, (b+1)/n_bins]
        bi = lax.broadcasted_iota(jnp.int32, (tn, _LANE), 1)       # [tile_n, 128]
        bf = bi.astype(jnp.float32)
        lower = bf * jnp.float32(inv_nbins)
        upper = jnp.where(bi >= n_bins - 1, jnp.float32(1.0),
                          (bf + 1.0) * jnp.float32(inv_nbins))
        in_bin = jnp.logical_and(conf > lower, conf <= upper)
        in_bin = jnp.logical_and(in_bin, bi < n_bins).astype(jnp.float32)

        # folded per-bin partial sums: sum((conf - acc) * in_bin) over rows
        bin_acc_ref[...] += jnp.sum(d * in_bin, axis=0, keepdims=True)   # [1, 128]

        @pl.when(step == num_steps - 1)
        def _finalize():
            out_ref[0, 0] = jnp.sum(jnp.abs(bin_acc_ref[...])) / jnp.float32(n_total)

    return ece_kernel


def _pick_tile_n(n, c, itemsize):
    """~4 MiB per (double-buffered) logits block; sublane-aligned partial tiles."""
    target_bytes = 4 * 1024 * 1024
    tile = max(1, target_bytes // max(1, c * itemsize))
    tile = min(tile, 2048)
    if tile >= n:
        return int(n)                     # single full-array block
    return int(max(8, (tile // 8) * 8))   # multiple of 8 for partial tiling


def ece_loss(logits, labels, t: float = 1.0, n_bins: int = 15, tile_n=None):
    """Expected Calibration Error.

    Args:
        logits: [N, C] float array of raw logits (native dtype is fine; bf16 halves DMA bytes).
        labels: [N] int array of ground-truth class indices.
        t:      temperature (static Python float).
        n_bins: number of confidence bins (<= 128).
        tile_n: optional override of the N-tile size.
    Returns:
        [1] float32 array containing the ECE value (matches torch.zeros(1) shape).
    """
    N, C = logits.shape
    assert n_bins <= _LANE, "n_bins must fit in one vreg lane width"

    if tile_n is None:
        tile_n = _pick_tile_n(N, C, logits.dtype.itemsize)
    else:
        tile_n = int(tile_n)
        if tile_n >= N:
            tile_n = N
        elif tile_n % 8 != 0:
            tile_n = max(8, (tile_n // 8) * 8)

    num_tiles = pl.cdiv(N, tile_n)
    labels2d = labels.astype(jnp.int32).reshape(N, 1)

    kernel = _make_ece_kernel(float(t), int(n_bins), int(N), int(tile_n))

    out = pl.pallas_call(
        kernel,
        out_shape=jax.ShapeDtypeStruct((1, 1), jnp.float32),
        grid_spec=pltpu.PrefetchScalarGridSpec(
            num_scalar_prefetch=0,
            grid=(num_tiles,),
            in_specs=[
                pl.BlockSpec((tile_n, C), lambda i: (i, 0)),   # logits (native dtype)
                pl.BlockSpec((tile_n, 1), lambda i: (i, 0)),   # labels int32
            ],
            out_specs=pl.BlockSpec(memory_space=pltpu.SMEM),    # scalar ECE
            scratch_shapes=[pltpu.VMEM((1, _LANE), jnp.float32)],  # per-bin accumulator
        ),
        compiler_params=pltpu.CompilerParams(
            dimension_semantics=("arbitrary",),        # accumulator across the N axis
            vmem_limit_bytes=48 * 1024 * 1024,
        ),
    )(logits, labels2d)

    return out.reshape(1)


def _ece_reference(logits, labels, t=1.0, n_bins=15):
    """Pure-JAX reference mirroring the PyTorch loop (for sanity checking)."""
    probs = jax.nn.softmax(logits.astype(jnp.float32) / t, axis=1)
    conf = jnp.max(probs, axis=1)
    pred = jnp.argmax(probs, axis=1)
    acc = (pred == labels).astype(jnp.float32)
    bounds = jnp.linspace(0.0, 1.0, n_bins + 1)
    ece = 0.0
    for b in range(n_bins):
        in_bin = (conf > bounds[b]) & (conf <= bounds[b + 1])
        cnt = jnp.sum(in_bin.astype(jnp.float32))
        sum_conf = jnp.sum(jnp.where(in_bin, conf, 0.0))
        sum_acc = jnp.sum(jnp.where(in_bin, acc, 0.0))
        ece = ece + jnp.where(cnt > 0, jnp.abs(sum_conf - sum_acc), 0.0)
    return ece / logits.shape[0]


if __name__ == "__main__":
    key = jax.random.PRNGKey(0)
    k1, k2, k3, k4 = jax.random.split(key, 4)

    # Test 1: single-tile path (N=128, C=8), temperature != 1.
    N1, C1 = 128, 8
    logits1 = jax.random.normal(k1, (N1, C1), dtype=jnp.float32) * 3.0
    labels1 = jax.random.randint(k2, (N1,), 0, C1, dtype=jnp.int32)
    ece1 = jax.block_until_ready(ece_loss(logits1, labels1, t=1.5, n_bins=15))
    ref1 = jax.block_until_ready(_ece_reference(logits1, labels1, t=1.5, n_bins=15))
    assert ece1.shape == (1,)
    assert abs(float(ece1[0]) - float(ref1)) < 1e-4, (float(ece1[0]), float(ref1))

    # Test 2: multi-tile grid with a ragged final tile (exercises the
    # cross-step accumulator and the in-kernel row mask).
    N2, C2 = 200, 16
    logits2 = jax.random.normal(k3, (N2, C2), dtype=jnp.float32) * 2.0
    labels2 = jax.random.randint(k4, (N2,), 0, C2, dtype=jnp.int32)
    ece2 = jax.block_until_ready(ece_loss(logits2, labels2, t=1.0, n_bins=15, tile_n=64))
    ref2 = jax.block_until_ready(_ece_reference(logits2, labels2, t=1.0, n_bins=15))
    assert abs(float(ece2[0]) - float(ref2)) < 1e-4, (float(ece2[0]), float(ref2))

    print("KERNEL_OK")
</pallas_src>

<mosaic_0001>
module attributes {stable_mosaic.version = 11 : i64} {
  func.func @ece_kernel(%arg0: i32, %arg1: memref<128x8xf32, #tpu.memory_space<vmem>>, %arg2: memref<128x1xi32, #tpu.memory_space<vmem>>, %arg3: memref<1x1xf32, #tpu.memory_space<smem>>, %arg4: memref<1x128xf32, #tpu.memory_space<vmem>>) attributes {dimension_semantics = [#tpu.dimension_semantics<arbitrary>], iteration_bounds = array<i64: 1>, scalar_prefetch = 0 : i64, scratch_operands = 1 : i64, tpu.core_type = #tpu.core_type<tc>, window_params = [{transform_indices = @transform_0, window_bounds = array<i64: 128, 8>}, {transform_indices = @transform_1, window_bounds = array<i64: 128, 1>}, {transform_indices = @transform_2, window_bounds = array<i64: 1, 1>}]} {
    %c0_i32 = arith.constant 0 : i32
    %0 = arith.cmpi eq, %arg0, %c0_i32 : i32
    %1 = arith.extui %0 : i1 to i32
    %c0_i32_0 = arith.constant 0 : i32
    %2 = arith.cmpi ne, %1, %c0_i32_0 : i32
    scf.if %2 {
      %cst_21 = arith.constant 0.000000e+00 : f32
      %67 = vector.broadcast %cst_21 : f32 to vector<1x128xf32>
      %c0_22 = arith.constant 0 : index
      %c0_23 = arith.constant 0 : index
      %68 = vector.load %arg4[%c0_22, %c0_23] : memref<1x128xf32, #tpu.memory_space<vmem>>, vector<1x128xf32>
      tpu.vector_store %arg4[%c0_22, %c0_23], %67 {strides = array<i32>} : memref<1x128xf32, #tpu.memory_space<vmem>>, vector<1x128xf32>,
    } else {
    }
    %c0 = arith.constant 0 : index
    %c0_1 = arith.constant 0 : index
    %3 = vector.load %arg1[%c0, %c0_1] : memref<128x8xf32, #tpu.memory_space<vmem>>, vector<128x8xf32>
    %cst = arith.constant 0.666666686 : f32
    %4 = vector.broadcast %cst : f32 to vector<128x8xf32>
    %5 = arith.mulf %3, %4 : vector<128x8xf32>
    %cst_2 = arith.constant dense<0xFF800000> : vector<128xf32>
    %6 = vector.multi_reduction <maximumf>, %5, %cst_2 [1] : vector<128x8xf32> to vector<128xf32>
    %7 = vector.shape_cast %6 : vector<128xf32> to vector<128x1xf32>
    %8 = vector.broadcast %7 : vector<128x1xf32> to vector<128x8xf32>
    %9 = arith.subf %5, %8 : vector<128x8xf32>
    %10 = math.exp %9 : vector<128x8xf32>
    %cst_3 = arith.constant dense<0.000000e+00> : vector<128xf32>
    %11 = vector.multi_reduction <add>, %10, %cst_3 [1] : vector<128x8xf32> to vector<128xf32>
    %12 = vector.shape_cast %11 : vector<128xf32> to vector<128x1xf32>
    %cst_4 = arith.constant 1.000000e+00 : f32
    %13 = vector.broadcast %cst_4 : f32 to vector<128x1xf32>
    %14 = arith.divf %13, %12 : vector<128x1xf32>
    %15 = tpu.iota {dimensions = array<i32: 1>} : vector<128x8xi32>
    %16 = vector.broadcast %7 : vector<128x1xf32> to vector<128x8xf32>
    %17 = arith.cmpf oeq, %5, %16 : vector<128x8xf32>
    %c8_i32 = arith.constant 8 : i32
    %18 = vector.broadcast %c8_i32 : i32 to vector<128x8xi32>
    %19 = arith.select %17, %15, %18 : vector<128x8xi1>, vector<128x8xi32>
    %cst_5 = arith.constant dense<2147483647> : vector<128xi32>
    %20 = vector.multi_reduction <minsi>, %19, %cst_5 [1] : vector<128x8xi32> to vector<128xi32>
    %21 = vector.shape_cast %20 : vector<128xi32> to vector<128x1xi32>
    %c0_6 = arith.constant 0 : index
    %c0_7 = arith.constant 0 : index
    %22 = vector.load %arg2[%c0_6, %c0_7] : memref<128x1xi32, #tpu.memory_space<vmem>>, vector<128x1xi32>
    %23 = arith.cmpi eq, %21, %22 : vector<128x1xi32>
    %24 = arith.extui %23 : vector<128x1xi1> to vector<128x1xi32>
    %25 = arith.sitofp %24 : vector<128x1xi32> to vector<128x1xf32>
    %26 = tpu.iota {dimensions = array<i32: 0>} : vector<128x1xi32>
    %c128_i32 = arith.constant 128 : i32
    %27 = arith.muli %arg0, %c128_i32 : i32
    %28 = vector.broadcast %27 : i32 to vector<128x1xi32>
    %29 = arith.addi %26, %28 : vector<128x1xi32>
    %c128_i32_8 = arith.constant 128 : i32
    %30 = vector.broadcast %c128_i32_8 : i32 to vector<128x1xi32>
    %31 = arith.cmpi slt, %29, %30 : vector<128x1xi32>
    %32 = arith.subf %14, %25 : vector<128x1xf32>
    %cst_9 = arith.constant 0.000000e+00 : f32
    %33 = vector.broadcast %cst_9 : f32 to vector<128x1xf32>
    %34 = arith.select %31, %32, %33 : vector<128x1xi1>, vector<128x1xf32>
    %35 = tpu.iota {dimensions = array<i32: 1>} : vector<128x128xi32>
    %36 = arith.sitofp %35 : vector<128x128xi32> to vector<128x128xf32>
    %cst_10 = arith.constant 0.0666666701 : f32
    %37 = vector.broadcast %cst_10 : f32 to vector<128x128xf32>
    %38 = arith.mulf %36, %37 : vector<128x128xf32>
    %c14_i32 = arith.constant 14 : i32
    %39 = vector.broadcast %c14_i32 : i32 to vector<128x128xi32>
    %40 = arith.cmpi sge, %35, %39 : vector<128x128xi32>
    %cst_11 = arith.constant 1.000000e+00 : f32
    %41 = vector.broadcast %cst_11 : f32 to vector<128x128xf32>
    %42 = arith.addf %36, %41 : vector<128x128xf32>
    %cst_12 = arith.constant 0.0666666701 : f32
    %43 = vector.broadcast %cst_12 : f32 to vector<128x128xf32>
    %44 = arith.mulf %42, %43 : vector<128x128xf32>
    %cst_13 = arith.constant 1.000000e+00 : f32
    %45 = vector.broadcast %cst_13 : f32 to vector<128x128xf32>
    %46 = arith.select %40, %45, %44 : vector<128x128xi1>, vector<128x128xf32>
    %47 = vector.broadcast %14 : vector<128x1xf32> to vector<128x128xf32>
    %48 = arith.cmpf ogt, %47, %38 : vector<128x128xf32>
    %49 = vector.broadcast %14 : vector<128x1xf32> to vector<128x128xf32>
    %50 = arith.cmpf ole, %49, %46 : vector<128x128xf32>
    %51 = arith.andi %48, %50 : vector<128x128xi1>
    %c15_i32 = arith.constant 15 : i32
    %52 = vector.broadcast %c15_i32 : i32 to vector<128x128xi32>
    %53 = arith.cmpi slt, %35, %52 : vector<128x128xi32>
    %54 = arith.andi %51, %53 : vector<128x128xi1>
    %55 = arith.extui %54 : vector<128x128xi1> to vector<128x128xi32>
    %56 = arith.sitofp %55 : vector<128x128xi32> to vector<128x128xf32>
    %c0_14 = arith.constant 0 : index
    %c0_15 = arith.constant 0 : index
    %57 = vector.load %arg4[%c0_14, %c0_15] : memref<1x128xf32, #tpu.memory_space<vmem>>, vector<1x128xf32>
    %58 = vector.broadcast %34 : vector<128x1xf32> to vector<128x128xf32>
    %59 = arith.mulf %58, %56 : vector<128x128xf32>
    %cst_16 = arith.constant dense<0.000000e+00> : vector<128xf32>
    %60 = vector.multi_reduction <add>, %59, %cst_16 [0] : vector<128x128xf32> to vector<128xf32>
    %61 = vector.shape_cast %60 : vector<128xf32> to vector<1x128xf32>
    %62 = arith.addf %57, %61 : vector<1x128xf32>
    %c0_17 = arith.constant 0 : index
    %c0_18 = arith.constant 0 : index
    %63 = vector.load %arg4[%c0_17, %c0_18] : memref<1x128xf32, #tpu.memory_space<vmem>>, vector<1x128xf32>
    tpu.vector_store %arg4[%c0_17, %c0_18], %62 {strides = array<i32>} : memref<1x128xf32, #tpu.memory_space<vmem>>, vector<1x128xf32>,
    %c0_i32_19 = arith.constant 0 : i32
    %64 = arith.cmpi eq, %arg0, %c0_i32_19 : i32
    %65 = arith.extui %64 : i1 to i32
    %c0_i32_20 = arith.constant 0 : i32
    %66 = arith.cmpi ne, %65, %c0_i32_20 : i32
    scf.if %66 {
      %c0_21 = arith.constant 0 : index
      %c0_22 = arith.constant 0 : index
      %67 = vector.load %arg4[%c0_21, %c0_22] : memref<1x128xf32, #tpu.memory_space<vmem>>, vector<1x128xf32>
      %68 = math.absf %67 : vector<1x128xf32>
      %69 = vector.shape_cast %68 : vector<1x128xf32> to vector<1x1x128xf32>
      %cst_23 = arith.constant dense<0.000000e+00> : vector<1xf32>
      %70 = vector.multi_reduction <add>, %69, %cst_23 [1, 2] : vector<1x1x128xf32> to vector<1xf32>
      %71 = vector.shape_cast %70 : vector<1xf32> to vector<1x1x1xf32>
      %72 = vector.extract %71[0, 0, 0] : f32 from vector<1x1x1xf32>
      %cst_24 = arith.constant 1.280000e+02 : f32
      %73 = arith.divf %72, %cst_24 : f32
      %c0_25 = arith.constant 0 : index
      %c0_26 = arith.constant 0 : index
      %74 = memref.load %arg3[%c0_25, %c0_26] : memref<1x1xf32, #tpu.memory_space<smem>>
      memref.store %73, %arg3[%c0_25, %c0_26] : memref<1x1xf32, #tpu.memory_space<smem>>
    } else {
    }
    return
  }
  func.func @transform_0(%arg0: i32) -> (i32, i32) {
    %c0_i32 = arith.constant 0 : i32
    %c0_i32_0 = arith.constant 0 : i32
    return %arg0, %c0_i32 : i32, i32
  }
  func.func @transform_1(%arg0: i32) -> (i32, i32) {
    %c0_i32 = arith.constant 0 : i32
    %c0_i32_0 = arith.constant 0 : i32
    return %arg0, %c0_i32 : i32, i32
  }
  func.func @transform_2(%arg0: i32) -> (i32, i32) {
    %c0_i32 = arith.constant 0 : i32
    %c0_i32_0 = arith.constant 0 : i32
    %c0_i32_1 = arith.constant 0 : i32
    return %c0_i32, %c0_i32_0 : i32, i32
  }
}

</mosaic_0001>

<bundles_post_ra>
// kernel: tpu_custom_call.1
= control target key start
LH: loop header
LB: loop body
LE: loop exit
PB: predicated region body
PF: predicated region fallthrough
CT: control target
= control target key end

     0   :  { %vm49_vm0 = vcmask 64512   ;;  %s1761_s0 = inlined_call_operand.vmem [shape: f32[128,8], index: 0, kind: input, shape index: {}]   ;;  %s1762_s1 = inlined_call_operand.vmem [shape: s32[128,1], index: 1, kind: input, shape index: {}]   ;;  %s1763_s2 = inlined_call_operand.hbm [shape: f32[1,1], index: 2, kind: output, shape index: {}]  }
   0x1   :  { %v17_v0 = vld [vmem:[%s1761_s0] sm:$0xff]  ;;  %v19_v1 = vld [vmem:[%s1761_s0 + $0x10] sm:$0xff]  ;;  %v18_v2 = vld [vmem:[%s1761_s0 + $0x8] sm:$0xff] }
   0x2   :  { %v1046_v3 = vmul.f32 0.6666667, %v17_v0  ;;  %v1048_v4 = vmul.f32 0.6666667, %v19_v1  ;;  %v1050_v5 = vmul.f32 0.6666667, %v18_v2 }
   0x3   :  { %v20_v6 = vld [vmem:[%s1761_s0 + $0x18] sm:$0xff]  ;;  %v21_v7 = vld [vmem:[%s1761_s0 + $0x20] sm:$0xff]  ;;  %v22_v8 = vld [vmem:[%s1761_s0 + $0x28] sm:$0xff] }
   0x4   :  { %v50_v9 = vsel %vm49_vm0, %v1046_v3, -inf  ;;  %v56_v10 = vsel %vm49_vm0, %v1048_v4, -inf  ;;  %v1065_v11 = vmul.f32 0.6666667, %v20_v6  ;;  %v53_v12 = vsel %vm49_vm0, %v1050_v5, -inf  ;;  %v23_v16 = vld [vmem:[%s1761_s0 + $0x30] sm:$0xff] }
   0x5   :  { %51 = vmax.xlane.f32.xlu0 %v50_v9  ;;  %57 = vmax.xlane.f32.xlu1 %v56_v10  ;;  %v1071_v14 = vmul.f32 0.6666667, %v21_v7  ;;  %v1073_v15 = vmul.f32 0.6666667, %v22_v8  ;;  %v24_v17 = vld [vmem:[%s1761_s0 + $0x38] sm:$0xff]  ;;  %v25_v22 = vld [vmem:[%s1761_s0 + $0x40] sm:$0xff] }
   0x6   :  { %v59_v13 = vsel %vm49_vm0, %v1065_v11, -inf  ;;  %v1085_v20 = vmul.f32 0.6666667, %v23_v16  ;;  %v1087_v21 = vmul.f32 0.6666667, %v24_v17  ;;  %v26_v23 = vld [vmem:[%s1761_s0 + $0x48] sm:$0xff] }
   0x7   :  { %v62_v18 = vsel %vm49_vm0, %v1071_v14, -inf  ;;  %v65_v19 = vsel %vm49_vm0, %v1073_v15, -inf }
   0x9   :  { %54 = vmax.xlane.f32.xlu0 %v53_v12  ;;  %60 = vmax.xlane.f32.xlu1 %v59_v13 }
   0xa   :  { %7 = vsyncpa [#allocation4], 0  ;;  %v68_v24 = vsel %vm49_vm0, %v1085_v20, -inf  ;;  %v71_v25 = vsel %vm49_vm0, %v1087_v21, -inf  ;;  %v1099_v26 = vmul.f32 0.6666667, %v25_v22  ;;  %v226_v48 = vlaneseq }
   0xb   :  { %v1101_v27 = vmul.f32 0.6666667, %v26_v23  ;;  %v27_v28 = vld [vmem:[%s1761_s0 + $0x50] sm:$0xff]  ;;  %v28_v29 = vld [vmem:[%s1761_s0 + $0x58] sm:$0xff]  ;;  %v29_v34 = vld [vmem:[%s1761_s0 + $0x60] sm:$0xff]  ;;  %s1007_s18 = scalar_lea.hbm %s1763_s2, 16 }
   0xc   :  { %v74_v30 = vsel %vm49_vm0, %v1099_v26, -inf  ;;  %v1113_v32 = vmul.f32 0.6666667, %v27_v28  ;;  %v1115_v33 = vmul.f32 0.6666667, %v28_v29  ;;  %v30_v35 = vld [vmem:[%s1761_s0 + $0x68] sm:$0xff]  ;;  %p1008_p0 = scmp.ne.s32.totalorder %s1763_s2, %s1007_s18  ;;  %p1011_p1 = scmp.lt.u32.totalorder %s1007_s18, %s1763_s2 }
   0xd   :  { %63 = vmax.xlane.f32.xlu0 %v62_v18  ;;  %66 = vmax.xlane.f32.xlu1 %v65_v19  ;;  %v77_v31 = vsel %vm49_vm0, %v1101_v27, -inf  ;;  %v1127_v38 = vmul.f32 0.6666667, %v29_v34  ;;  %v1129_v39 = vmul.f32 0.6666667, %v30_v35  ;;  %v31_v40 = vld [vmem:[%s1761_s0 + $0x70] sm:$0xff] }
   0xe   :  { %v80_v36 = vsel %vm49_vm0, %v1113_v32, -inf  ;;  %v83_v37 = vsel %vm49_vm0, %v1115_v33, -inf  ;;  %v32_v41 = vld [vmem:[%s1761_s0 + $0x78] sm:$0xff]  ;;  %v1141_v44 = vmul.f32 0.6666667, %v31_v40  ;;  %v1149_v49 = vand.u32 127, %v226_v48  ;;  %p1013_p2 = pnand %p1011_p1, %p1008_p0 }
   0xf   :  { %v86_v42 = vsel %vm49_vm0, %v1127_v38, -inf  ;;  %v89_v43 = vsel %vm49_vm0, %v1129_v39, -inf  ;;  %v1143_v45 = vmul.f32 0.6666667, %v32_v41 }
  0x10   :  { %v92_v46 = vsel %vm49_vm0, %v1141_v44, -inf }
  0x11   :  { %69 = vmax.xlane.f32.xlu0 %v68_v24  ;;  %72 = vmax.xlane.f32.xlu1 %v71_v25  ;;  %v95_v47 = vsel %vm49_vm0, %v1143_v45, -inf }
  0x15   :  { %75 = vmax.xlane.f32.xlu0 %v74_v30  ;;  %78 = vmax.xlane.f32.xlu1 %v77_v31 }
  0x19   :  { %81 = vmax.xlane.f32.xlu0 %v80_v36  ;;  %84 = vmax.xlane.f32.xlu1 %v83_v37 }
  0x1d   :  { %87 = vmax.xlane.f32.xlu0 %v86_v42  ;;  %90 = vmax.xlane.f32.xlu1 %v89_v43 }
  0x21   :  { %93 = vmax.xlane.f32.xlu0 %v92_v46  ;;  %96 = vmax.xlane.f32.xlu1 %v95_v47 }
  0x92   :  { %v1151_v50 = vpop.xlane.xlu0 %51  ;;  %v1153_v51 = vpop.xlane.xlu1 %57 }
  0x93   :  { %vm228_vm1 = vcmp.eq.f32.partialorder %v1046_v3, %v1151_v50  ;;  %vm230_vm2 = vcmp.eq.f32.partialorder %v1048_v4, %v1153_v51  ;;  %v98_v37 = vsub.f32 %v1046_v3, %v1151_v50  ;;  %v100_v3 = vsub.f32 %v1048_v4, %v1153_v51 }
  0x94   :  { %v244_v52 = vsel %vm228_vm1, %v1149_v49, 8  ;;  %v246_v53 = vsel %vm230_vm2, %v1149_v49, 8 }
  0x95   :  { %v1162_v54 = vsel %vm49_vm0, %v244_v52, 2147483647  ;;  %v1170_v58 = vsel %vm49_vm0, %v246_v53, 2147483647  ;;  %v114_v53 = vmul.f32 1.442695, %v98_v37 }
  0x96   :  { %v1164_v55 = vpop.xlane.xlu0 %54  ;;  %v1166_v56 = vpop.xlane.xlu1 %60  ;;  %v262_v57 = vshra.s32 %v1162_v54, 16  ;;  %v292_v62 = vshra.s32 %v1170_v58, 16 }
  0x97   :  { %vm229_vm3 = vcmp.eq.f32.partialorder %v1050_v5, %v1164_v55  ;;  %vm231_vm4 = vcmp.eq.f32.partialorder %v1065_v11, %v1166_v56  ;;  %943 = vpow2.f32 %v114_v53 }
  0x98   :  { %v245_v59 = vsel %vm229_vm3, %v1149_v49, 8  ;;  %v1177_v60 = vcvt.s32.f32 %v262_v57  ;;  %v247_v61 = vsel %vm231_vm4, %v1149_v49, 8  ;;  %v1197_v7 = vcvt.s32.f32 %v292_v62 }
  0x99   :  { %v1187_v1 = vsel %vm49_vm0, %v245_v59, 2147483647  ;;  %v1192_v2 = vsel %vm49_vm0, %v247_v61, 2147483647  ;;  %v99_v57 = vsub.f32 %v1050_v5, %v1164_v55  ;;  %v101_v5 = vsub.f32 %v1065_v11, %v1166_v56 }
  0x9a   :  { %265 = vmin.xlane.f32.xlu0 %v1177_v60  ;;  %v1182_v63 = vpop.xlane.xlu0 %63  ;;  %v1184_v0 = vpop.xlane.xlu1 %66  ;;  %v277_v9 = vshra.s32 %v1187_v1, 16  ;;  %v307_v13 = vshra.s32 %v1192_v2, 16 }
  0x9b   :  { %vm232_vm5 = vcmp.eq.f32.partialorder %v1071_v14, %v1182_v63  ;;  %vm233_vm6 = vcmp.eq.f32.partialorder %v1073_v15, %v1184_v0  ;;  %v103_v53 = vsub.f32 %v1073_v15, %v1184_v0 }
  0x9c   :  { %v248_v6 = vsel %vm232_vm5, %v1149_v49, 8  ;;  %v249_v8 = vsel %vm233_vm6, %v1149_v49, 8  ;;  %v1210_v17 = vcvt.s32.f32 %v277_v9  ;;  %v1221_v22 = vcvt.s32.f32 %v307_v13 }
  0x9d   :  { %v1208_v16 = vsel %vm49_vm0, %v248_v6, 2147483647  ;;  %v1215_v18 = vsel %vm49_vm0, %v249_v8, 2147483647  ;;  %v118_v9 = vmul.f32 1.442695, %v100_v3 }
  0x9e   :  { %295 = vmin.xlane.f32.xlu0 %v1197_v7  ;;  %v1202_v10 = vpop.xlane.xlu0 %69  ;;  %v1204_v12 = vpop.xlane.xlu1 %72  ;;  %280 = vmin.xlane.f32.xlu1 %v1210_v17  ;;  %v322_v23 = vshra.s32 %v1208_v16, 16  ;;  %v337_v28 = vshra.s32 %v1215_v18, 16  ;;  %v116_v13 = vmul.f32 1.442695, %v99_v57  ;;  %v120_v3 = vmul.f32 1.442695, %v101_v5 }
  0x9f   :  { %vm234_vm7 = vcmp.eq.f32.partialorder %v1085_v20, %v1202_v10  ;;  %vm235_vm8 = vcmp.eq.f32.partialorder %v1087_v21, %v1204_v12  ;;  %945 = vpow2.f32 %v118_v9 }
  0xa0   :  { %v250_v19 = vsel %vm234_vm7, %v1149_v49, 8  ;;  %v251_v30 = vsel %vm235_vm8, %v1149_v49, 8  ;;  %v1233_v31 = vcvt.s32.f32 %v322_v23  ;;  %v1242_v35 = vcvt.s32.f32 %v337_v28 }
  0xa1   :  { %v1230_v29 = vsel %vm49_vm0, %v250_v19, 2147483647  ;;  %v1252_v42 = vsel %vm49_vm0, %v251_v30, 2147483647  ;;  %947 = vpow2.f32 %v116_v13 }
  0xa2   :  { %v1224_v24 = vpop.xlane.xlu0 %75  ;;  %v1226_v25 = vpop.xlane.xlu1 %78  ;;  %310 = vmin.xlane.f32.xlu1 %v1221_v22  ;;  %325 = vmin.xlane.f32.xlu0 %v1233_v31  ;;  %v352_v36 = vshra.s32 %v1230_v29, 16  ;;  %v367_v50 = vshra.s32 %v1252_v42, 16  ;;  %949 = vpow2.f32 %v120_v3 }
  0xa3   :  { %vm236_vm9 = vcmp.eq.f32.partialorder %v1099_v26, %v1224_v24  ;;  %vm237_vm10 = vcmp.eq.f32.partialorder %v1101_v27, %v1226_v25 }
  0xa4   :  { %v252_v34 = vsel %vm236_vm9, %v1149_v49, 8  ;;  %v253_v46 = vsel %vm237_vm10, %v1149_v49, 8  ;;  %v1258_v47 = vcvt.s32.f32 %v352_v36  ;;  %v1281_v62 = vcvt.s32.f32 %v367_v50 }
  0xa5   :  { %v1255_v43 = vsel %vm49_vm0, %v252_v34, 2147483647  ;;  %v1278_v51 = vsel %vm49_vm0, %v253_v46, 2147483647  ;;  %v102_v36 = vsub.f32 %v1071_v14, %v1182_v63 }
  0xa6   :  { %v1247_v40 = vpop.xlane.xlu0 %81  ;;  %v1249_v41 = vpop.xlane.xlu1 %84  ;;  %340 = vmin.xlane.f32.xlu1 %v1242_v35  ;;  %355 = vmin.xlane.f32.xlu0 %v1258_v47  ;;  %v382_v52 = vshra.s32 %v1255_v43, 16  ;;  %v397_v55 = vshra.s32 %v1278_v51, 16 }
  0xa7   :  { %vm238_vm11 = vcmp.eq.f32.partialorder %v1113_v32, %v1247_v40  ;;  %vm239_vm12 = vcmp.eq.f32.partialorder %v1115_v33, %v1249_v41  ;;  %v122_v5 = vmul.f32 1.442695, %v102_v36  ;;  %v104_v36 = vsub.f32 %v1085_v20, %v1202_v10 }
  0xa8   :  { %v254_v48 = vsel %vm238_vm11, %v1149_v49, 8  ;;  %v255_v61 = vsel %vm239_vm12, %v1149_v49, 8  ;;  %v1283_v6 = vcvt.s32.f32 %v382_v52  ;;  %v1307_v56 = vcvt.s32.f32 %v397_v55 }
  0xa9   :  { %v1286_v8 = vsel %vm49_vm0, %v254_v48, 2147483647  ;;  %v1304_v34 = vsel %vm49_vm0, %v255_v61, 2147483647  ;;  %951 = vpow2.f32 %v122_v5  ;;  %v106_v10 = vsub.f32 %v1099_v26, %v1224_v24 }
  0xaa   :  { %v1273_v59 = vpop.xlane.xlu0 %87  ;;  %v1275_v4 = vpop.xlane.xlu1 %90  ;;  %370 = vmin.xlane.f32.xlu1 %v1281_v62  ;;  %385 = vmin.xlane.f32.xlu0 %v1283_v6  ;;  %v412_v23 = vshra.s32 %v1286_v8, 16  ;;  %v427_v48 = vshra.s32 %v1304_v34, 16 }
  0xab   :  { %vm240_vm13 = vcmp.eq.f32.partialorder %v1127_v38, %v1273_v59  ;;  %vm241_vm14 = vcmp.eq.f32.partialorder %v1129_v39, %v1275_v4 }
  0xac   :  { %v256_v19 = vsel %vm240_vm13, %v1149_v49, 8  ;;  %v257_v11 = vsel %vm241_vm14, %v1149_v49, 8  ;;  %v1313_v37 = vcvt.s32.f32 %v412_v23  ;;  %v1331_v57 = vcvt.s32.f32 %v427_v48 }
  0xad   :  { %v1321_v50 = vsel %vm49_vm0, %v256_v19, 2147483647  ;;  %v1327_v52 = vsel %vm49_vm0, %v257_v11, 2147483647  ;;  %v124_v11 = vmul.f32 1.442695, %v103_v53 }
  0xae   :  { %v1299_v28 = vpop.xlane.xlu0 %93  ;;  %v1301_v30 = vpop.xlane.xlu1 %96  ;;  %400 = vmin.xlane.f32.xlu1 %v1307_v56  ;;  %415 = vmin.xlane.f32.xlu0 %v1313_v37  ;;  %v442_v63 = vshra.s32 %v1321_v50, 16  ;;  %v457_v61 = vshra.s32 %v1327_v52, 16 }
  0xaf   :  { %vm242_vm15 = vcmp.eq.f32.partialorder %v1141_v44, %v1299_v28  ;;  %vm243_vm1 = vcmp.eq.f32.partialorder %v1143_v45, %v1301_v30  ;;  %953 = vpow2.f32 %v124_v11 }
  0xb0   :  { %v258_v46 = vsel %vm242_vm15, %v1149_v49, 8  ;;  %v259_v14 = vsel %vm243_vm1, %v1149_v49, 8  ;;  %v1337_v55 = vcvt.s32.f32 %v442_v63  ;;  %v1344_v23 = vcvt.s32.f32 %v457_v61 }
  0xb1   :  { %v1335_v9 = vsel %vm49_vm0, %v258_v46, 2147483647  ;;  %v1341_v19 = vsel %vm49_vm0, %v259_v14, 2147483647  ;;  %v944_v46 = vpop.eup %943  ;;  %v126_v61 = vmul.f32 1.442695, %v104_v36 }
  0xb2   :  { %v472_v13 = vshra.s32 %v1335_v9, 16  ;;  %430 = vmin.xlane.f32.xlu1 %v1331_v57  ;;  %v487_v15 = vshra.s32 %v1341_v19, 16  ;;  %445 = vmin.xlane.f32.xlu0 %v1337_v55  ;;  %v946_v14 = vpop.eup %945  ;;  %v146_v3 = vsel %vm49_vm0, %v944_v46, 0.0 }
  0xb3   :  { %v948_v63 = vpop.eup %947  ;;  %955 = vpow2.f32 %v126_v61 }
  0xb4   :  { %v1348_v0 = vcvt.s32.f32 %v472_v13  ;;  %v1353_v48 = vcvt.s32.f32 %v487_v15  ;;  %v105_v13 = vsub.f32 %v1087_v21, %v1204_v12  ;;  %v149_v53 = vsel %vm49_vm0, %v948_v63, 0.0  ;;  %v950_v5 = vpop.eup %949 }
  0xb5   :  { %v152_v15 = vsel %vm49_vm0, %v946_v14, 0.0  ;;  %v952_v11 = vpop.eup %951  ;;  %v130_v21 = vmul.f32 1.442695, %v106_v10  ;;  %v107_v12 = vsub.f32 %v1101_v27, %v1226_v25  ;;  %v155_v36 = vsel %vm49_vm0, %v950_v5, 0.0 }
  0xb6   :  { %460 = vmin.xlane.f32.xlu1 %v1344_v23  ;;  %475 = vmin.xlane.f32.xlu0 %v1348_v0  ;;  %v128_v20 = vmul.f32 1.442695, %v105_v13  ;;  %v158_v46 = vsel %vm49_vm0, %v952_v11, 0.0  ;;  %v108_v5 = vsub.f32 %v1113_v32, %v1247_v40  ;;  %v109_v11 = vsub.f32 %v1115_v33, %v1249_v41 }
  0xb7   :  { %v132_v26 = vmul.f32 1.442695, %v107_v12  ;;  %v110_v12 = vsub.f32 %v1127_v38, %v1273_v59  ;;  %v112_v33 = vsub.f32 %v1141_v44, %v1299_v28 }
  0xb8   :  { %957 = vpow2.f32 %v128_v20 }
  0xb9   :  { %v954_v61 = vpop.eup %953  ;;  %959 = vpow2.f32 %v130_v21  ;;  %v136_v21 = vmul.f32 1.442695, %v109_v11  ;;  %v142_v41 = vmul.f32 1.442695, %v112_v33 }
  0xba   :  { %490 = vmin.xlane.f32.xlu1 %v1353_v48  ;;  %147 = vadd.xlane.f32.xlu0 %v146_v3  ;;  %v161_v24 = vsel %vm49_vm0, %v954_v61, 0.0  ;;  %961 = vpow2.f32 %v132_v26  ;;  %v111_v61 = vsub.f32 %v1129_v39, %v1275_v4  ;;  %v113_v39 = vsub.f32 %v1143_v45, %v1301_v30 }
  0xbc   :  { %v140_v32 = vmul.f32 1.442695, %v111_v61 }
  0xbd   :  { %v956_v63 = vpop.eup %955 }
  0xbe   :  { %150 = vadd.xlane.f32.xlu1 %v149_v53  ;;  %153 = vadd.xlane.f32.xlu0 %v152_v15  ;;  %v164_v14 = vsel %vm49_vm0, %v956_v63, 0.0  ;;  %v1019_v53 = vmov 0.0   ;;  %v134_v15 = vmul.f32 1.442695, %v108_v5  ;;  %v321_v5 = vand.u32 65535, %v1208_v16 }
  0xbf   :  { %16 = vst [vmem:[#allocation2] sm:$0x1] %v1019_v53 }
  0xc0   :  { %963 = vpow2.f32 %v134_v15 }
  0xc1   :  { %965 = vpow2.f32 %v136_v21 }
  0xc2   :  { %156 = vadd.xlane.f32.xlu1 %v155_v36  ;;  %159 = vadd.xlane.f32.xlu0 %v158_v46  ;;  %v958_v13 = vpop.eup %957  ;;  %v261_v36 = vand.u32 65535, %v1162_v54  ;;  %v138_v46 = vmul.f32 1.442695, %v110_v12  ;;  %v276_v54 = vand.u32 65535, %v1187_v1  ;;  %v144_v1 = vmul.f32 1.442695, %v113_v39 }
  0xc3   :  { %v167_v27 = vsel %vm49_vm0, %v958_v13, 0.0  ;;  %v960_v25 = vpop.eup %959  ;;  %v1020_v39 = vmov 0  }
  0xc4   :  { %v170_v3 = vsel %vm49_vm0, %v960_v25, 0.0  ;;  %v962_v20 = vpop.eup %961  ;;  %967 = vpow2.f32 %v138_v46  ;;  %v278_v44 = vcvt.s32.f32 %v276_v54  ;;  %941 = vset.pattern.permute.xlu0 %v1020_v39  ;;  %942 = vset.pattern.permute.xlu1 %v1020_v39 }
  0xc5   :  { %v173_v10 = vsel %vm49_vm0, %v962_v20, 0.0  ;;  %969 = vpow2.f32 %v140_v32 }
  0xc6   :  { %162 = vadd.xlane.f32.xlu0 %v161_v24  ;;  %v263_v24 = vcvt.s32.f32 %v261_v36  ;;  %971 = vpow2.f32 %v142_v41  ;;  %v336_v36 = vand.u32 65535, %v1215_v18  ;;  %v471_v41 = vand.u32 65535, %v1335_v9 }
  0xc7   :  { %973 = vpow2.f32 %v144_v1 }
  0xca   :  { %165 = vadd.xlane.f32.xlu0 %v164_v14  ;;  %v964_v38 = vpop.eup %963 }
  0xcb   :  { %v176_v4 = vsel %vm49_vm0, %v964_v38, 0.0  ;;  %v966_v63 = vpop.eup %965 }
  0xcc   :  { %v179_v45 = vsel %vm49_vm0, %v966_v63, 0.0 }
  0xce   :  { %168 = vadd.xlane.f32.xlu0 %v167_v27  ;;  %v968_v30 = vpop.eup %967 }
  0xcf   :  { %v970_v20 = vpop.eup %969 }
  0xd0   :  { %v185_v11 = vsel %vm49_vm0, %v970_v20, 0.0 }
  0xd2   :  { %171 = vadd.xlane.f32.xlu0 %v170_v3  ;;  %v182_v3 = vsel %vm49_vm0, %v968_v30, 0.0 }
  0xd6   :  { %174 = vadd.xlane.f32.xlu0 %v173_v10 }
 0x127   :  { %v1383_v26 = vpop.xlane.xlu0 %265 }
 0x128   :  { %vm267_vm2 = vcmp.eq.f32.partialorder %v1177_v60, %v1383_v26  ;;  %v291_v60 = vand.u32 65535, %v1170_v58  ;;  %v306_v58 = vand.u32 65535, %v1192_v2  ;;  %v972_v2 = vpop.eup %971 }
 0x129   :  { %v268_v40 = vsel %vm267_vm2, %v263_v24, inf  ;;  %v188_v16 = vsel %vm49_vm0, %v972_v2, 0.0  ;;  %v974_v61 = vpop.eup %973  ;;  %v338_v24 = vcvt.s32.f32 %v336_v36 }
 0x12a   :  { %269 = vmin.xlane.f32.xlu0 %v268_v40  ;;  %v293_v25 = vcvt.s32.f32 %v291_v60  ;;  %v191_v40 = vsel %vm49_vm0, %v974_v61, 0.0 }
 0x12b   :  { %v1392_v59 = vpop.xlane.xlu0 %295  ;;  %v1395_v14 = vpop.xlane.xlu1 %280 }
 0x12c   :  { %vm282_vm3 = vcmp.eq.f32.partialorder %v1210_v17, %v1395_v14  ;;  %vm297_vm4 = vcmp.eq.f32.partialorder %v1197_v7, %v1392_v59  ;;  %v308_v7 = vcvt.s32.f32 %v306_v58 }
 0x12d   :  { %v283_v28 = vsel %vm282_vm3, %v278_v44, inf  ;;  %v298_v17 = vsel %vm297_vm4, %v293_v25, inf  ;;  %v473_v44 = vcvt.s32.f32 %v471_v41  ;;  %v426_v25 = vand.u32 65535, %v1304_v34 }
 0x12e   :  { %177 = vadd.xlane.f32.xlu0 %v176_v4  ;;  %284 = vmin.xlane.f32.xlu1 %v283_v28 }
 0x12f   :  { %v1403_v13 = vpop.xlane.xlu1 %310  ;;  %v1405_v27 = vpop.xlane.xlu0 %325 }
 0x130   :  { %vm312_vm5 = vcmp.eq.f32.partialorder %v1221_v22, %v1403_v13  ;;  %vm327_vm6 = vcmp.eq.f32.partialorder %v1233_v31, %v1405_v27  ;;  %v323_v22 = vcvt.s32.f32 %v321_v5  ;;  %v351_v31 = vand.u32 65535, %v1230_v29 }
 0x131   :  { %v313_v15 = vsel %vm312_vm5, %v308_v7, inf }
 0x132   :  { %180 = vadd.xlane.f32.xlu0 %v179_v45  ;;  %299 = vmin.xlane.f32.xlu1 %v298_v17  ;;  %v328_v46 = vsel %vm327_vm6, %v323_v22, inf  ;;  %v353_v38 = vcvt.s32.f32 %v351_v31  ;;  %v411_v45 = vand.u32 65535, %v1286_v8  ;;  %v500_v31 = vld [vmem:[%s1762_s1] sm:$0xff] }
 0x133   :  { %v1411_v10 = vpop.xlane.xlu0 %355  ;;  %v1417_v21 = vpop.xlane.xlu1 %340 }
 0x134   :  { %vm342_vm7 = vcmp.eq.f32.partialorder %v1242_v35, %v1417_v21  ;;  %vm357_vm8 = vcmp.eq.f32.partialorder %v1258_v47, %v1411_v10  ;;  %v366_v35 = vand.u32 65535, %v1252_v42  ;;  %v381_v47 = vand.u32 65535, %v1255_v43 }
 0x135   :  { %v343_v33 = vsel %vm342_vm7, %v338_v24, inf  ;;  %v358_v29 = vsel %vm357_vm8, %v353_v38, inf  ;;  %v413_v30 = vcvt.s32.f32 %v411_v45  ;;  %v287_v38 = vcvt.f32.s32 %v1395_v14 }
 0x136   :  { %183 = vadd.xlane.f32.xlu0 %v182_v3  ;;  %314 = vmin.xlane.f32.xlu1 %v313_v15  ;;  %v368_v4 = vcvt.s32.f32 %v366_v35  ;;  %v383_v1 = vcvt.s32.f32 %v381_v47  ;;  %v456_v3 = vand.u32 65535, %v1327_v52 }
 0x137   :  { %v1419_v12 = vpop.xlane.xlu0 %385  ;;  %v1431_v18 = vpop.xlane.xlu1 %370  ;;  %v288_v39 = vshll.u32 %v287_v38, 16 }
 0x138   :  { %vm372_vm0 = vcmp.eq.f32.partialorder %v1281_v62, %v1431_v18  ;;  %vm387_vm10 = vcmp.eq.f32.partialorder %v1283_v6, %v1419_v12  ;;  %v396_v62 = vand.u32 65535, %v1278_v51  ;;  %v428_v51 = vcvt.s32.f32 %v426_v25 }
 0x139   :  { %v373_v60 = vsel %vm372_vm0, %v368_v4, inf  ;;  %v388_v28 = vsel %vm387_vm10, %v383_v1, inf  ;;  %v302_v4 = vcvt.f32.s32 %v1392_v59  ;;  %v502_v59 = vld [vmem:[%s1762_s1 + $0x10] sm:$0xff] }
 0x13a   :  { %186 = vadd.xlane.f32.xlu0 %v185_v11  ;;  %329 = vmin.xlane.f32.xlu1 %v328_v46  ;;  %v398_v43 = vcvt.s32.f32 %v396_v62  ;;  %v272_v46 = vcvt.f32.s32 %v1383_v26  ;;  %v317_v62 = vcvt.f32.s32 %v1403_v13  ;;  %v332_v13 = vcvt.f32.s32 %v1405_v27 }
 0x13b   :  { %v1426_v32 = vpop.xlane.xlu0 %415  ;;  %v1446_v9 = vpop.xlane.xlu1 %400  ;;  %v303_v1 = vshll.u32 %v302_v4, 16  ;;  %v506_v4 = vld [vmem:[%s1762_s1 + $0x30] sm:$0xff] }
 0x13c   :  { %vm402_vm11 = vcmp.eq.f32.partialorder %v1307_v56, %v1446_v9  ;;  %vm417_vm12 = vcmp.eq.f32.partialorder %v1313_v37, %v1426_v32  ;;  %v441_v56 = vand.u32 65535, %v1321_v50  ;;  %v486_v50 = vand.u32 65535, %v1341_v19 }
 0x13d   :  { %v418_v58 = vsel %vm417_vm12, %v413_v30, inf  ;;  %v273_v61 = vshll.u32 %v272_v46, 16 }
 0x13e   :  { %189 = vadd.xlane.f32.xlu0 %v188_v16  ;;  %344 = vmin.xlane.f32.xlu1 %v343_v33  ;;  %v443_v37 = vcvt.s32.f32 %v441_v56  ;;  %v488_v5 = vcvt.s32.f32 %v486_v50 }
 0x13f   :  { %v1434_v54 = vpop.xlane.xlu0 %445  ;;  %v1454_v6 = vpop.xlane.xlu1 %430 }
 0x140   :  { %vm432_vm13 = vcmp.eq.f32.partialorder %v1331_v57, %v1454_v6  ;;  %vm447_vm14 = vcmp.eq.f32.partialorder %v1337_v55, %v1434_v54  ;;  %v458_v57 = vcvt.s32.f32 %v456_v3 }
 0x141   :  { %v433_v8 = vsel %vm432_vm13, %v428_v51, inf  ;;  %v448_v20 = vsel %vm447_vm14, %v443_v37, inf  ;;  %v318_v51 = vshll.u32 %v317_v62, 16  ;;  %v503_v37 = vld [vmem:[%s1762_s1 + $0x18] sm:$0xff] }
 0x142   :  { %192 = vadd.xlane.f32.xlu0 %v191_v40  ;;  %359 = vmin.xlane.f32.xlu1 %v358_v29 }
 0x143   :  { %v1440_v63 = vpop.xlane.xlu0 %475  ;;  %v1460_v17 = vpop.xlane.xlu1 %460 }
 0x144   :  { %vm477_vm9 = vcmp.eq.f32.partialorder %v1348_v0, %v1440_v63  ;;  %v403_v0 = vsel %vm402_vm11, %v398_v43, inf  ;;  %vm462_vm15 = vcmp.eq.f32.partialorder %v1344_v23, %v1460_v17 }
 0x145   :  { %v478_v42 = vsel %vm477_vm9, %v473_v44, inf  ;;  %v463_v7 = vsel %vm462_vm15, %v458_v57, inf  ;;  %v501_v44 = vld [vmem:[%s1762_s1 + $0x8] sm:$0xff] }
 0x146   :  { %374 = vmin.xlane.f32.xlu1 %v373_v60  ;;  %479 = vmin.xlane.f32.xlu0 %v478_v42 }
 0x147   :  { %v1467_v34 = vpop.xlane.xlu1 %490  ;;  %v148_v15 = vpop.xlane.xlu0 %147 }
 0x148   :  { %vm492_vm1 = vcmp.eq.f32.partialorder %v1353_v48, %v1467_v34  ;;  %975 = vrcp.f32 %v148_v15 }
 0x149   :  { %v493_v55 = vsel %vm492_vm1, %v488_v5, inf  ;;  %v347_v5 = vcvt.f32.s32 %v1417_v21 }
 0x14a   :  { %389 = vmin.xlane.f32.xlu1 %v388_v28 }
 0x14b   :  { %v154_v52 = vpop.xlane.xlu0 %153  ;;  %v151_v16 = vpop.xlane.xlu1 %150  ;;  %v348_v21 = vshll.u32 %v347_v5, 16 }
 0x14c   :  { %977 = vrcp.f32 %v151_v16 }
 0x14d   :  { %979 = vrcp.f32 %v154_v52  ;;  %v504_v52 = vld [vmem:[%s1762_s1 + $0x20] sm:$0xff] }
 0x14e   :  { %404 = vmin.xlane.f32.xlu1 %v403_v0 }
 0x14f   :  { %v160_v11 = vpop.xlane.xlu0 %159  ;;  %v157_v33 = vpop.xlane.xlu1 %156 }
 0x150   :  { %981 = vrcp.f32 %v157_v33 }
 0x151   :  { %983 = vrcp.f32 %v160_v11 }
 0x152   :  { %419 = vmin.xlane.f32.xlu1 %v418_v58  ;;  %v1485_v35 = vpop.eup %975 }
 0x153   :  { %v163_v2 = vpop.xlane.xlu0 %162 }
 0x154   :  { %985 = vrcp.f32 %v163_v2 }
 0x156   :  { %434 = vmin.xlane.f32.xlu1 %v433_v8  ;;  %v1496_v43 = vpop.eup %977 }
 0x157   :  { %v1472_v22 = vpop.xlane.xlu0 %165  ;;  %v1506_v8 = vpop.eup %979 }
 0x158   :  { %987 = vrcp.f32 %v1472_v22 }
 0x15a   :  { %449 = vmin.xlane.f32.xlu1 %v448_v20 }
 0x15b   :  { %v1474_v23 = vpop.xlane.xlu0 %168 }
 0x15c   :  { %989 = vrcp.f32 %v1474_v23 }
 0x15e   :  { %464 = vmin.xlane.f32.xlu1 %v463_v7  ;;  %v333_v7 = vshll.u32 %v332_v13, 16 }
 0x15f   :  { %v1476_v36 = vpop.xlane.xlu0 %171 }
 0x160   :  { %991 = vrcp.f32 %v1476_v36 }
 0x162   :  { %494 = vmin.xlane.f32.xlu1 %v493_v55  ;;  %v1514_v55 = vpop.eup %981 }
 0x163   :  { %v1478_v19 = vpop.xlane.xlu0 %174 }
 0x164   :  { %993 = vrcp.f32 %v1478_v19 }
 0x1b7   :  { %v270_v48 = vpop.xlane.xlu0 %269 }
 0x1b8   :  { %v271_v24 = vcvt.f32.s32 %v270_v48  ;;  %v362_v48 = vcvt.f32.s32 %v1411_v10 }
 0x1ba   :  { %v274_v40 = vadd.s32 %v273_v61, %v271_v24  ;;  %v1525_v24 = vpop.eup %983  ;;  %v363_v10 = vshll.u32 %v362_v48, 16 }
 0x1bb   :  { %v285_v26 = vpop.xlane.xlu1 %284  ;;  %v1493_v60 = vpop.xlane.xlu0 %177 }
 0x1bc   :  { %vm516_vm2 = vcmp.eq.s32.totalorder %v274_v40, %v500_v31  ;;  %v286_v47 = vcvt.f32.s32 %v285_v26  ;;  %v505_v31 = vld [vmem:[%s1762_s1 + $0x28] sm:$0xff]  ;;  %v377_v26 = vcvt.f32.s32 %v1431_v18  ;;  %v392_v18 = vcvt.f32.s32 %v1419_v12 }
 0x1bd   :  { %v904_v41 = vsel %vm516_vm2, 1.0, %v1019_v53  ;;  %v407_v12 = vcvt.f32.s32 %v1446_v9  ;;  %995 = vrcp.f32 %v1493_v60  ;;  %v422_v9 = vcvt.f32.s32 %v1426_v32 }
 0x1be   :  { %v615_v29 = vsub.f32 %v1485_v35, %v904_v41  ;;  %v289_v14 = vadd.s32 %v288_v39, %v286_v47  ;;  %v1536_v39 = vpop.eup %985  ;;  %v437_v32 = vcvt.f32.s32 %v1454_v6  ;;  %vm649_vm2 = vcmp.ge.s32.totalorder %v1149_v49, 14 }
 0x1bf   :  { %v300_v42 = vpop.xlane.xlu1 %299  ;;  %v1503_v25 = vpop.xlane.xlu0 %180 }
 0x1c0   :  { %753 = vperm.xlu0 %941, %v615_v29   ;;  %vm517_vm3 = vcmp.eq.s32.totalorder %v289_v14, %v501_v44  ;;  %v301_v28 = vcvt.f32.s32 %v300_v42  ;;  %v378_v42 = vshll.u32 %v377_v26, 16  ;;  %v1545_v62 = vpop.eup %987  ;;  %997 = vrcp.f32 %v1503_v25 }
 0x1c1   :  { %v905_v45 = vsel %vm517_vm3, 1.0, %v1019_v53  ;;  %v1554_v13 = vpop.eup %989 }
 0x1c2   :  { %v304_v0 = vadd.s32 %v303_v1, %v301_v28  ;;  %v616_v30 = vsub.f32 %v1496_v43, %v905_v45  ;;  %v1563_v5 = vpop.eup %991 }
 0x1c3   :  { %v315_v58 = vpop.xlane.xlu1 %314  ;;  %v1516_v15 = vpop.xlane.xlu0 %183 }
 0x1c4   :  { %vm518_vm4 = vcmp.eq.s32.totalorder %v304_v0, %v502_v59  ;;  %v316_v56 = vcvt.f32.s32 %v315_v58  ;;  %758 = vperm.xlu1 %942, %v616_v30   ;;  %v507_v59 = vld [vmem:[%s1762_s1 + $0x38] sm:$0xff]  ;;  %v393_v58 = vshll.u32 %v392_v18, 16  ;;  %999 = vrcp.f32 %v1516_v15 }
 0x1c5   :  { %v906_v3 = vsel %vm518_vm4, 1.0, %v1019_v53 }
 0x1c6   :  { %v319_v20 = vadd.s32 %v318_v51, %v316_v56  ;;  %v617_v57 = vsub.f32 %v1506_v8, %v906_v3  ;;  %v508_v56 = vld [vmem:[%s1762_s1 + $0x40] sm:$0xff] }
 0x1c7   :  { %v330_v50 = vpop.xlane.xlu1 %329  ;;  %v1533_v22 = vpop.xlane.xlu0 %186 }
 0x1c8   :  { %vm519_vm5 = vcmp.eq.s32.totalorder %v319_v20, %v503_v37  ;;  %v331_v27 = vcvt.f32.s32 %v330_v50  ;;  %763 = vperm.xlu1 %942, %v617_v57   ;;  %v408_v50 = vshll.u32 %v407_v12, 16  ;;  %1001 = vrcp.f32 %v1533_v22  ;;  %v512_v22 = vld [vmem:[%s1762_s1 + $0x60] sm:$0xff] }
 0x1c9   :  { %v907_v11 = vsel %vm519_vm5, 1.0, %v1019_v53 }
 0x1ca   :  { %v334_v46 = vadd.s32 %v333_v7, %v331_v27  ;;  %v618_v2 = vsub.f32 %v1514_v55, %v907_v11  ;;  %v509_v27 = vld [vmem:[%s1762_s1 + $0x48] sm:$0xff] }
 0x1cb   :  { %v345_v16 = vpop.xlane.xlu1 %344  ;;  %v190_v28 = vpop.xlane.xlu0 %189 }
 0x1cc   :  { %vm520_vm6 = vcmp.eq.s32.totalorder %v334_v46, %v504_v52  ;;  %v346_v61 = vcvt.f32.s32 %v345_v16  ;;  %768 = vperm.xlu1 %942, %v618_v2   ;;  %v423_v2 = vshll.u32 %v422_v9, 16  ;;  %1003 = vrcp.f32 %v190_v28 }
 0x1cd   :  { %v908_v33 = vsel %vm520_vm6, 1.0, %v1019_v53 }
 0x1ce   :  { %v349_v40 = vadd.s32 %v348_v21, %v346_v61  ;;  %v619_v38 = vsub.f32 %v1525_v24, %v908_v33  ;;  %v1572_v21 = vpop.eup %993  ;;  %v510_v61 = vld [vmem:[%s1762_s1 + $0x50] sm:$0xff]  ;;  %v482_v33 = vcvt.f32.s32 %v1440_v63 }
 0x1cf   :  { %v360_v41 = vpop.xlane.xlu1 %359  ;;  %v193_v19 = vpop.xlane.xlu0 %192 }
 0x1d0   :  { %vm521_vm7 = vcmp.eq.s32.totalorder %v349_v40, %v505_v31  ;;  %v361_v29 = vcvt.f32.s32 %v360_v41  ;;  %773 = vperm.xlu1 %942, %v619_v38   ;;  %v452_v38 = vcvt.f32.s32 %v1434_v54  ;;  %v438_v41 = vshll.u32 %v437_v32, 16 }
 0x1d1   :  { %v909_v47 = vsel %vm521_vm7, 1.0, %v1019_v53  ;;  %1005 = vrcp.f32 %v193_v19 }
 0x1d2   :  { %v364_v44 = vadd.s32 %v363_v10, %v361_v29  ;;  %v620_v23 = vsub.f32 %v1536_v39, %v909_v47  ;;  %v1582_v29 = vpop.eup %995  ;;  %v483_v47 = vshll.u32 %v482_v33, 16 }
 0x1d3   :  { %v375_v14 = vpop.xlane.xlu1 %374  ;;  %v480_v48 = vpop.xlane.xlu0 %479 }
 0x1d4   :  { %vm522_vm8 = vcmp.eq.s32.totalorder %v364_v44, %v506_v4  ;;  %v376_v1 = vcvt.f32.s32 %v375_v14  ;;  %778 = vperm.xlu1 %942, %v620_v23   ;;  %v481_v10 = vcvt.f32.s32 %v480_v48  ;;  %v511_v4 = vld [vmem:[%s1762_s1 + $0x58] sm:$0xff]  ;;  %v467_v44 = vcvt.f32.s32 %v1460_v17 }
 0x1d5   :  { %v910_v45 = vsel %vm522_vm8, 1.0, %v1019_v53  ;;  %v453_v14 = vshll.u32 %v452_v38, 16  ;;  %vm701_vm8 = vcmp.lt.s32.totalorder %v1149_v49, 15 }
 0x1d6   :  { %v379_v0 = vadd.s32 %v378_v42, %v376_v1  ;;  %v621_v30 = vsub.f32 %v1545_v62, %v910_v45  ;;  %v484_v42 = vadd.s32 %v483_v47, %v481_v10  ;;  %v1591_v1 = vpop.eup %997 }
 0x1d7   :  { %v390_v36 = vpop.xlane.xlu1 %389  ;;  %v1602_v12 = vpop.eup %999 }
 0x1d8   :  { %vm523_vm0 = vcmp.eq.s32.totalorder %v379_v0, %v507_v59  ;;  %v391_v51 = vcvt.f32.s32 %v390_v36  ;;  %783 = vperm.xlu1 %942, %v621_v30   ;;  %v514_v59 = vld [vmem:[%s1762_s1 + $0x70] sm:$0xff]  ;;  %v468_v0 = vshll.u32 %v467_v44, 16  ;;  %v497_v36 = vcvt.f32.s32 %v1467_v34 }
 0x1d9   :  { %v911_v37 = vsel %vm523_vm0, 1.0, %v1019_v53  ;;  %vm530_vm13 = vcmp.eq.s32.totalorder %v484_v42, %v514_v59 }
 0x1da   :  { %v394_v3 = vadd.s32 %v393_v58, %v391_v51  ;;  %v622_v20 = vsub.f32 %v1554_v13, %v911_v37  ;;  %v513_v51 = vld [vmem:[%s1762_s1 + $0x68] sm:$0xff]  ;;  %v918_v19 = vsel %vm530_vm13, 1.0, %v1019_v53  ;;  %v498_v34 = vshll.u32 %v497_v36, 16 }
 0x1db   :  { %v405_v57 = vpop.xlane.xlu1 %404 }
 0x1dc   :  { %vm524_vm9 = vcmp.eq.s32.totalorder %v394_v3, %v508_v56  ;;  %v406_v7 = vcvt.f32.s32 %v405_v57  ;;  %788 = vperm.xlu1 %942, %v622_v20   ;;  %v1610_v57 = vpop.eup %1001 }
 0x1dd   :  { %v912_v52 = vsel %vm524_vm9, 1.0, %v1019_v53  ;;  %v1612_v9 = vpop.eup %1003 }
 0x1de   :  { %v409_v11 = vadd.s32 %v408_v50, %v406_v7  ;;  %v623_v46 = vsub.f32 %v1563_v5, %v912_v52  ;;  %v515_v7 = vld [vmem:[%s1762_s1 + $0x78] sm:$0xff] }
 0x1df   :  { %v420_v60 = vpop.xlane.xlu1 %419 }
 0x1e0   :  { %vm525_vm10 = vcmp.eq.s32.totalorder %v409_v11, %v509_v27  ;;  %v421_v16 = vcvt.f32.s32 %v420_v60  ;;  %793 = vperm.xlu1 %942, %v623_v46   ;;  %v629_v11 = vsub.f32 %v1612_v9, %v918_v19  ;;  %v1620_v60 = vpop.eup %1005 }
 0x1e1   :  { %v913_v31 = vsel %vm525_vm10, 1.0, %v1019_v53 }
 0x1e2   :  { %v424_v40 = vadd.s32 %v423_v2, %v421_v16  ;;  %v624_v25 = vsub.f32 %v1572_v21, %v913_v31  ;;  %v647_v16 = vcvt.s32.f32 %v1149_v49 }
 0x1e3   :  { %v435_v6 = vpop.xlane.xlu1 %434 }
 0x1e4   :  { %vm526_vm11 = vcmp.eq.s32.totalorder %v424_v40, %v510_v61  ;;  %v436_v26 = vcvt.f32.s32 %v435_v6  ;;  %798 = vperm.xlu0 %941, %v624_v25   ;;  %v650_v48 = vadd.f32 1.0, %v647_v16  ;;  %v1626_v33 = vmul.f32 0.06666667, %v647_v16 }
 0x1e5   :  { %v914_v63 = vsel %vm526_vm11, 1.0, %v1019_v53 }
 0x1e6   :  { %v439_v54 = vadd.s32 %v438_v41, %v436_v26  ;;  %v625_v15 = vsub.f32 %v1582_v29, %v914_v63  ;;  %v651_v61 = vmul.f32 0.06666667, %v650_v48  ;;  %vm653_vm3 = vcmp.gt.f32.partialorder %v1485_v35, %v1626_v33 }
 0x1e7   :  { %v450_v23 = vpop.xlane.xlu1 %449  ;;  %vm654_vm5 = vcmp.gt.f32.partialorder %v1496_v43, %v1626_v33  ;;  %vm655_vm0 = vcmp.gt.f32.partialorder %v1506_v8, %v1626_v33 }
 0x1e8   :  { %vm527_vm12 = vcmp.eq.s32.totalorder %v439_v54, %v511_v4  ;;  %v451_v18 = vcvt.f32.s32 %v450_v23  ;;  %803 = vperm.xlu1 %942, %v625_v15   ;;  %v1628_v40 = vsel %vm649_vm2, 1.0, %v651_v61 }
 0x1e9   :  { %v915_v45 = vsel %vm527_vm12, 1.0, %v1019_v53  ;;  %vm669_vm4 = vcmp.le.f32.partialorder %v1485_v35, %v1628_v40  ;;  %vm670_vm6 = vcmp.le.f32.partialorder %v1496_v43, %v1628_v40  ;;  %vm671_vm9 = vcmp.le.f32.partialorder %v1506_v8, %v1628_v40 }
 0x1ea   :  { %v454_v17 = vadd.s32 %v453_v14, %v451_v18  ;;  %v626_v28 = vsub.f32 %v1591_v1, %v915_v45  ;;  %vm685_vm7 = vmand %vm653_vm3, %vm669_vm4  ;;  %vm656_vm12 = vcmp.gt.f32.partialorder %v1514_v55, %v1626_v33  ;;  %vm672_vm13 = vcmp.le.f32.partialorder %v1514_v55, %v1628_v40 }
 0x1eb   :  { %v465_v30 = vpop.xlane.xlu1 %464  ;;  %vm686_vm10 = vmand %vm654_vm5, %vm670_vm6  ;;  %vm673_vm2 = vcmp.le.f32.partialorder %v1525_v24, %v1628_v40  ;;  %vm658_vm5 = vcmp.gt.f32.partialorder %v1536_v39, %v1626_v33  ;;  %vm674_vm6 = vcmp.le.f32.partialorder %v1536_v39, %v1628_v40 }
 0x1ec   :  { %vm528_vm14 = vcmp.eq.s32.totalorder %v454_v17, %v512_v22  ;;  %v466_v58 = vcvt.f32.s32 %v465_v30  ;;  %808 = vperm.xlu0 %941, %v626_v28   ;;  %vm1645_vm11 = vmand %vm685_vm7, %vm701_vm8 }
 0x1ed   :  { %v916_v56 = vsel %vm528_vm14, 1.0, %v1019_v53  ;;  %vm687_vm14 = vmand %vm655_vm0, %vm671_vm9  ;;  %vm659_vm9 = vcmp.gt.f32.partialorder %v1545_v62, %v1626_v33 }
 0x1ee   :  { %v469_v37 = vadd.s32 %v468_v0, %v466_v58  ;;  %v627_v3 = vsub.f32 %v1602_v12, %v916_v56  ;;  %vm688_vm3 = vmand %vm656_vm12, %vm672_vm13 }
 0x1ef   :  { %v495_v20 = vpop.xlane.xlu1 %494  ;;  %vm704_vm4 = vmand %vm687_vm14, %vm701_vm8  ;;  %vm660_vm14 = vcmp.gt.f32.partialorder %v1554_v13, %v1626_v33 }
 0x1f0   :  { %vm529_vm15 = vcmp.eq.s32.totalorder %v469_v37, %v513_v51  ;;  %v496_v50 = vcvt.f32.s32 %v495_v20  ;;  %813 = vperm.xlu1 %942, %v627_v3   ;;  %vm705_vm0 = vmand %vm688_vm3, %vm701_vm8  ;;  %v922_v39 = vsel %vm704_vm4, 1.0, %v1019_v53  ;;  %vm677_vm3 = vcmp.le.f32.partialorder %v1563_v5, %v1628_v40 }
 0x1f1   :  { %v917_v27 = vsel %vm529_vm15, 1.0, %v1019_v53  ;;  %vm703_vm15 = vmand %vm686_vm10, %vm701_vm8  ;;  %vm675_vm10 = vcmp.le.f32.partialorder %v1545_v62, %v1628_v40  ;;  %v923_v62 = vsel %vm705_vm0, 1.0, %v1019_v53 }
 0x1f2   :  { %v499_v52 = vadd.s32 %v498_v34, %v496_v50  ;;  %v628_v46 = vsub.f32 %v1610_v57, %v917_v27  ;;  %v921_v55 = vsel %vm703_vm15, 1.0, %v1019_v53  ;;  %vm690_vm12 = vmand %vm658_vm5, %vm674_vm6  ;;  %vm676_vm15 = vcmp.le.f32.partialorder %v1554_v13, %v1628_v40 }
 0x1f3   :  { %vm692_vm4 = vmand %vm660_vm14, %vm676_vm15  ;;  %vm662_vm6 = vcmp.gt.f32.partialorder %v1572_v21, %v1626_v33 }
 0x1f4   :  { %vm531_vm1 = vcmp.eq.s32.totalorder %v499_v52, %v515_v7  ;;  %823 = vperm.xlu1 %942, %v629_v11   ;;  %818 = vperm.xlu0 %941, %v628_v46  }
 0x1f5   :  { %v919_v2 = vsel %vm531_vm1, 1.0, %v1019_v53  ;;  %vm657_vm1 = vcmp.gt.f32.partialorder %v1525_v24, %v1626_v33  ;;  %v920_v24 = vsel %vm1645_vm11, 1.0, %v1019_v53  ;;  %vm707_vm11 = vmand %vm690_vm12, %vm701_vm8  ;;  %vm679_vm12 = vcmp.le.f32.partialorder %v1582_v29, %v1628_v40 }
 0x1f6   :  { %v630_v32 = vsub.f32 %v1620_v60, %v919_v2  ;;  %vm689_vm7 = vmand %vm657_vm1, %vm673_vm2  ;;  %vm661_vm2 = vcmp.gt.f32.partialorder %v1563_v5, %v1626_v33  ;;  %v925_v23 = vsel %vm707_vm11, 1.0, %v1019_v53  ;;  %vm664_vm11 = vcmp.gt.f32.partialorder %v1591_v1, %v1626_v33 }
 0x1f7   :  { %vm706_vm13 = vmand %vm689_vm7, %vm701_vm8  ;;  %vm678_vm7 = vcmp.le.f32.partialorder %v1572_v21, %v1628_v40 }
 0x1f8   :  { %828 = vperm.xlu0 %941, %v630_v32   ;;  %vm691_vm1 = vmand %vm659_vm9, %vm675_vm10  ;;  %v924_v54 = vsel %vm706_vm13, 1.0, %v1019_v53  ;;  %vm663_vm10 = vcmp.gt.f32.partialorder %v1582_v29, %v1626_v33 }
 0x1f9   :  { %vm708_vm5 = vmand %vm691_vm1, %vm701_vm8 }
 0x1fa   :  { %vm693_vm0 = vmand %vm661_vm2, %vm677_vm3  ;;  %v926_v42 = vsel %vm708_vm5, 1.0, %v1019_v53  ;;  %vm680_vm2 = vcmp.le.f32.partialorder %v1591_v1, %v1628_v40  ;;  %vm665_vm5 = vcmp.gt.f32.partialorder %v1602_v12, %v1626_v33 }
 0x1fb   :  { %vm709_vm9 = vmand %vm692_vm4, %vm701_vm8 }
 0x1fc   :  { %vm694_vm13 = vmand %vm662_vm6, %vm678_vm7  ;;  %v927_v21 = vsel %vm709_vm9, 1.0, %v1019_v53  ;;  %vm681_vm6 = vcmp.le.f32.partialorder %v1602_v12, %v1628_v40  ;;  %vm666_vm9 = vcmp.gt.f32.partialorder %v1610_v57, %v1626_v33 }
 0x1fd   :  { %vm710_vm14 = vmand %vm693_vm0, %vm701_vm8 }
 0x1fe   :  { %vm695_vm15 = vmand %vm663_vm10, %vm679_vm12  ;;  %v928_v29 = vsel %vm710_vm14, 1.0, %v1019_v53  ;;  %vm682_vm10 = vcmp.le.f32.partialorder %v1610_v57, %v1628_v40  ;;  %vm683_vm14 = vcmp.le.f32.partialorder %v1612_v9, %v1628_v40 }
 0x1ff   :  { %vm711_vm1 = vmand %vm694_vm13, %vm701_vm8  ;;  %vm667_vm13 = vcmp.gt.f32.partialorder %v1612_v9, %v1626_v33 }
 0x200   :  { %vm712_vm3 = vmand %vm695_vm15, %vm701_vm8  ;;  %v929_v36 = vsel %vm711_vm1, 1.0, %v1019_v53  ;;  %vm668_vm1 = vcmp.gt.f32.partialorder %v1620_v60, %v1626_v33 }
 0x201   :  { %vm696_vm4 = vmand %vm664_vm11, %vm680_vm2  ;;  %v930_v1 = vsel %vm712_vm3, 1.0, %v1019_v53  ;;  %vm684_vm11 = vcmp.le.f32.partialorder %v1620_v60, %v1628_v40 }
 0x202   :  { %vm713_vm7 = vmand %vm696_vm4, %vm701_vm8 }
 0x203   :  { %vm697_vm0 = vmand %vm665_vm5, %vm681_vm6  ;;  %v931_v19 = vsel %vm713_vm7, 1.0, %v1019_v53 }
 0x204   :  { %vm714_vm12 = vmand %vm697_vm0, %vm701_vm8 }
 0x205   :  { %vm698_vm15 = vmand %vm666_vm9, %vm682_vm10  ;;  %v932_v57 = vsel %vm714_vm12, 1.0, %v1019_v53 }
 0x206   :  { %vm699_vm2 = vmand %vm667_vm13, %vm683_vm14 }
 0x207   :  { %vm715_vm3 = vmand %vm698_vm15, %vm701_vm8 }
 0x208   :  { %vm700_vm4 = vmand %vm668_vm1, %vm684_vm11  ;;  %v933_v46 = vsel %vm715_vm3, 1.0, %v1019_v53 }
 0x209   :  { %vm716_vm5 = vmand %vm699_vm2, %vm701_vm8 }
 0x20a   :  { %vm717_vm6 = vmand %vm700_vm4, %vm701_vm8  ;;  %v934_v60 = vsel %vm716_vm5, 1.0, %v1019_v53  ;;  %vm875_vm8 = vcmask 1040384  }
 0x20b   :  { %v935_v61 = vsel %vm717_vm6, 1.0, %v1019_v53 }
 0x23f   :  { %v754_v8 = vpop.permute.xlu0 %753 }
 0x240   :  { %v831_v26 = vmul.f32 %v920_v24, %v754_v8 }
 0x243   :  { %v759_v31 = vpop.permute.xlu1 %758 }
 0x244   :  { %v832_v41 = vmul.f32 %v921_v55, %v759_v31  ;;  %v750_v55 = vld [vmem:[#allocation2] sm:$0x1] }
 0x246   :  { %v847_v63 = vadd.f32 %v832_v41, %v831_v26 }
 0x247   :  { %v764_v25 = vpop.permute.xlu1 %763 }
 0x248   :  { %v833_v4 = vmul.f32 %v922_v39, %v764_v25 }
 0x24a   :  { %v848_v44 = vadd.f32 %v847_v63, %v833_v4 }
 0x24b   :  { %v769_v38 = vpop.permute.xlu1 %768 }
 0x24c   :  { %v834_v47 = vmul.f32 %v923_v62, %v769_v38 }
 0x24e   :  { %v849_v14 = vadd.f32 %v848_v44, %v834_v47 }
 0x24f   :  { %v774_v6 = vpop.permute.xlu1 %773 }
 0x250   :  { %v835_v13 = vmul.f32 %v924_v54, %v774_v6 }
 0x252   :  { %v850_v18 = vadd.f32 %v849_v14, %v835_v13 }
 0x253   :  { %v779_v43 = vpop.permute.xlu1 %778 }
 0x254   :  { %v836_v5 = vmul.f32 %v925_v23, %v779_v43 }
 0x256   :  { %v851_v45 = vadd.f32 %v850_v18, %v836_v5 }
 0x257   :  { %v784_v10 = vpop.permute.xlu1 %783 }
 0x258   :  { %v837_v59 = vmul.f32 %v926_v42, %v784_v10 }
 0x25a   :  { %v852_v0 = vadd.f32 %v851_v45, %v837_v59 }
 0x25b   :  { %v789_v15 = vpop.permute.xlu1 %788 }
 0x25c   :  { %v838_v17 = vmul.f32 %v927_v21, %v789_v15 }
 0x25e   :  { %v853_v58 = vadd.f32 %v852_v0, %v838_v17 }
 0x25f   :  { %v794_v22 = vpop.permute.xlu1 %793 }
 0x260   :  { %v839_v30 = vmul.f32 %v928_v29, %v794_v22 }
 0x262   :  { %v854_v37 = vadd.f32 %v853_v58, %v839_v30 }
 0x263   :  { %v799_v28 = vpop.permute.xlu0 %798 }
 0x264   :  { %v840_v51 = vmul.f32 %v929_v36, %v799_v28 }
 0x266   :  { %v855_v20 = vadd.f32 %v854_v37, %v840_v51 }
 0x267   :  { %v804_v56 = vpop.permute.xlu1 %803 }
 0x268   :  { %v841_v3 = vmul.f32 %v930_v1, %v804_v56 }
 0x26a   :  { %v856_v12 = vadd.f32 %v855_v20, %v841_v3 }
 0x26b   :  { %v809_v34 = vpop.permute.xlu0 %808 }
 0x26c   :  { %v842_v50 = vmul.f32 %v931_v19, %v809_v34 }
 0x26e   :  { %v857_v7 = vadd.f32 %v856_v12, %v842_v50 }
 0x26f   :  { %v814_v27 = vpop.permute.xlu1 %813 }
 0x270   :  { %v843_v52 = vmul.f32 %v932_v57, %v814_v27 }
 0x272   :  { %v858_v11 = vadd.f32 %v857_v7, %v843_v52 }
 0x273   :  { %v824_v9 = vpop.permute.xlu1 %823  ;;  %v819_v2 = vpop.permute.xlu0 %818 }
 0x274   :  { %v844_v32 = vmul.f32 %v933_v46, %v819_v2  ;;  %v845_v16 = vmul.f32 %v934_v60, %v824_v9 }
 0x276   :  { %v859_v48 = vadd.f32 %v858_v11, %v844_v32 }
 0x277   :  { %v829_v31 = vpop.permute.xlu0 %828 }
 0x278   :  { %v860_v33 = vadd.f32 %v859_v48, %v845_v16  ;;  %v846_v40 = vmul.f32 %v935_v61, %v829_v31 }
 0x27a   :  { %v861_v25 = vadd.f32 %v860_v33, %v846_v40 }
 0x27c   :  { %v862_v38 = vrot.slane %v861_v25, 4 }
 0x27e   :  { %v863_v6 = vadd.f32 %v862_v38, %v861_v25 }
 0x280   :  { %v864_v35 = vrot.slane %v863_v6, 2 }
 0x282   :  { %v865_v43 = vadd.f32 %v864_v35, %v863_v6 }
 0x284   :  { %v866_v8 = vrot.slane %v865_v43, 1 }
 0x286   :  { %v867_v41 = vadd.f32 %v866_v8, %v865_v43 }
 0x288   :  { %v868_v24 = vadd.f32 %v867_v41, %v750_v55 }
 0x28a   :  { %869 = vst [vmem:[#allocation2] sm:$0x1] %v868_v24 }
 0x291   :  { %v873_v49 = vld [vmem:[#allocation2] sm:$0x1] }
 0x292   :  { %v874_v39 = vand.u32 2147483647, %v873_v49 }
 0x294   :  { %v876_v10 = vsel %vm875_vm8, %v874_v39, 0.0 }
 0x295   :  { %877 = vadd.xlane.f32.xlu1 %v876_v10 }
 0x322   :  { %v878_v26 = vpop.xlane.xlu1 %877 }
 0x323   :  { %v879_v53 = vrot.slane %v878_v26, 4 }
 0x325   :  { %v880_v4 = vadd.f32 %v879_v53, %v878_v26 }
 0x327   :  { %v881_v62 = vrot.slane %v880_v4, 2 }
 0x329   :  { %v882_v63 = vadd.f32 %v881_v62, %v880_v4 }
 0x32b   :  { %v883_v47 = vrot.slane %v882_v63, 1 }
 0x32d   :  { %v884_v54 = vadd.f32 %v883_v47, %v882_v63 }
 0x32f   :  { %936 = vpush %v884_v54 }
 0x360   :  { %s937_s1 = spop %936 }
 0x361   :  { %s888_s15 = smul.f32 0.0078125, %s937_s1 }
 0x363   :  { %890 = sst [smem:[#allocation3]] %s888_s15 }
 0x364   :  { %1016 = shalt.err (!%p1013_p2)
}
 0x365   :  { %s1021_s23 = smov [#allocation3]  }
 0x366   :  { %898 = dma.smem_to_hbm %s1021_s23, 16, %s1763_s2, [#allocation4]  }
 0x367   :  { %1017 = dma.done.wait [#allocation4], 16  }
 0x368   :  { %1018 = vsyncadd [#allocation4], 4294967280 }
 0x369   :  { %902 = sfence }
 0x36a   :  { %903 = vsyncpa [#allocation4], 1 }

</bundles_post_ra>
